<compile_context>
chip_gen: v7x
topology: tpu7x:2x2x1
jax: 0.10.0
libtpu: 0.0.40
codegen_flags: <defaults>
</compile_context>

<pallas_src>
import functools

import jax
import jax.numpy as jnp
from jax.experimental import pallas as pl
from jax.experimental.pallas import tpu as pltpu


def _round_up(x: int, m: int) -> int:
    return ((x + m - 1) // m) * m


def _cdiv(a: int, b: int) -> int:
    return (a + b - 1) // b


@functools.lru_cache(maxsize=None)
def _vmem_limit_bytes() -> int:
    """Scoped-VMEM limit derived from the chip (v5e/v6e: 128 MiB, v7x: 64 MiB)."""
    cap = 64 * 1024 * 1024  # conservative fallback = v7x per-core VMEM
    try:
        cap = int(pltpu.get_tpu_info().vmem_capacity_bytes)
    except Exception:
        pass
    return int(min(max(cap - 4 * 1024 * 1024, 32 * 1024 * 1024), 112 * 1024 * 1024))


def _choose_tiles(B, D, N_pad, x_bytes, w_bytes, out_bytes):
    """Pick (tm, tn, tk).

    Goals:
      * one class (j) tile for typical heads       -> X read from HBM once
      * one reduction (k) tile whenever D fits     -> weight resident in VMEM,
        no accumulator round-trips, no padded copy of X
      * batch tile rounded to the sublane multiple; >= 2 batch tiles when B is
        large enough so the v7x megacore gets work on both TensorCores
      * working set budgeted against the real per-core VMEM capacity
    """
    sub = 8 if x_bytes >= 4 else (16 if x_bytes == 2 else 32)

    tn = min(N_pad, 1024)

    if B <= 2 * sub:
        tm = _round_up(B, sub)
    elif B <= 1024:
        tm = _round_up(_cdiv(B, 2), sub)          # >= 2 i-tiles for megacore
    else:
        tm = 512

    tk = D                                        # whole reduction in one step

    budget = int(0.65 * _vmem_limit_bytes())

    def working_set(tm_, tk_):
        multi_k = tk_ < D
        return (2 * tm_ * tk_ * x_bytes               # feature tiles (dbl-buffered)
                + 2 * tk_ * tn * w_bytes              # weight panel
                + 2 * tm_ * tn * out_bytes            # logits tiles
                + 2 * 8 * tn * 4                      # bias
                + (tm_ * tn * 4 if multi_k else 0))   # f32 accumulator scratch

    # Shrink the batch tile first (keeps the weight resident); only if a single
    # weight/feature panel cannot fit do we fall back to a k-tiled reduction.
    while working_set(tm, tk) > budget and tm > max(sub, 128):
        tm = max(sub, _round_up(tm // 2, sub))
    while working_set(tm, tk) > budget and tk > 512:
        tk = max(512, _round_up(tk // 2, 128))

    return tm, tn, tk


def _clip_linear_kernel_fused(c_ref, x_ref, w_ref, b_ref, o_ref, *, compute_dtype):
    """Fast path: whole reduction dim in one tile -> no accumulator scratch."""
    # c_ref: SMEM (1,) f32 clip threshold (scalar prefetch)
    # x_ref: VMEM [tm, D]   feature tile; w_ref: VMEM [D, tn] resident weight
    # b_ref: VMEM [1, tn]   bias;         o_ref: VMEM [tm, tn] logits tile
    c = c_ref[0]
    clipped = jnp.clip(x_ref[...], -c, c).astype(compute_dtype)      # VPU
    acc = jnp.dot(clipped, w_ref[...],
                  preferred_element_type=jnp.float32)                # MXU
    o_ref[...] = (acc + b_ref[...]).astype(o_ref.dtype)


def _clip_linear_kernel_ktiled(c_ref, x_ref, w_ref, b_ref, o_ref, acc_ref, *,
                               compute_dtype):
    """Fallback for very large hidden dims: k-tiled reduction with f32 acc."""
    k = pl.program_id(2)

    @pl.when(k == 0)
    def _():
        acc_ref[...] = jnp.zeros_like(acc_ref)

    c = c_ref[0]
    clipped = jnp.clip(x_ref[...], -c, c).astype(compute_dtype)
    acc_ref[...] += jnp.dot(clipped, w_ref[...],
                            preferred_element_type=jnp.float32)

    @pl.when(k == pl.num_programs(2) - 1)
    def _():
        o_ref[...] = (acc_ref[...] + b_ref[...]).astype(o_ref.dtype)


@functools.partial(
    jax.jit,
    static_argnames=("tm", "tn", "tk", "compute_dtype", "vmem_limit"))
def _feature_clipping_forward_impl(c_arr, features, weight_t, bias_row, *,
                                   tm, tn, tk, compute_dtype, vmem_limit):
    B, D = features.shape
    N_pad = weight_t.shape[1]

    x = features
    w = weight_t
    x_bytes = x.dtype.itemsize
    w_bytes = w.dtype.itemsize
    out_dtype = features.dtype

    num_k = 1
    D_eff = D
    if tk < D:
        # Rare fallback (very large hidden dim): tile the reduction axis.
        # TODO(synk): only pads along D (never the batch axis).
        D_eff = _round_up(D, tk)
        if D_eff != D:
            x = jnp.pad(x, ((0, 0), (0, D_eff - D)))
            w = jnp.pad(w, ((0, D_eff - D), (0, 0)))
        num_k = D_eff // tk

    grid_i = _cdiv(B, tm)   # no padded copy of X; last batch block is partial
    grid_j = _cdiv(N_pad, tn)

    if num_k == 1:
        kernel = functools.partial(_clip_linear_kernel_fused,
                                   compute_dtype=compute_dtype)
        grid = (grid_i, grid_j)
        in_specs = [
            pl.BlockSpec((tm, D_eff), lambda i, j, c: (i, 0)),    # features
            pl.BlockSpec((D_eff, tn), lambda i, j, c: (0, j)),    # weight (resident)
            pl.BlockSpec((1, tn), lambda i, j, c: (0, j)),        # bias
        ]
        out_spec = pl.BlockSpec((tm, tn), lambda i, j, c: (i, j))
        scratch = ()
        dims = ("parallel", "parallel")
    else:
        kernel = functools.partial(_clip_linear_kernel_ktiled,
                                   compute_dtype=compute_dtype)
        grid = (grid_i, grid_j, num_k)
        in_specs = [
            pl.BlockSpec((tm, tk), lambda i, j, k, c: (i, k)),
            pl.BlockSpec((tk, tn), lambda i, j, k, c: (k, j)),
            pl.BlockSpec((1, tn), lambda i, j, k, c: (0, j)),
        ]
        out_spec = pl.BlockSpec((tm, tn), lambda i, j, k, c: (i, j))
        scratch = (pltpu.VMEM((tm, tn), jnp.float32),)
        dims = ("parallel", "parallel", "arbitrary")

    grid_spec = pltpu.PrefetchScalarGridSpec(
        num_scalar_prefetch=1,
        grid=grid,
        in_specs=in_specs,
        out_specs=out_spec,
        scratch_shapes=scratch,
    )

    # Advisory cost: X streamed once; W re-read only when it cannot stay resident.
    w_reads = 1 if (grid_j == 1 and num_k == 1) else grid_i
    cost = pl.CostEstimate(
        flops=2 * B * D_eff * N_pad,
        transcendentals=0,
        bytes_accessed=(B * D_eff * x_bytes
                        + w_reads * D_eff * N_pad * w_bytes
                        + B * N_pad * out_dtype.itemsize),
    )

    out_padded = pl.pallas_call(
        kernel,
        out_shape=jax.ShapeDtypeStruct((B, N_pad), out_dtype),
        grid_spec=grid_spec,
        compiler_params=pltpu.CompilerParams(
            dimension_semantics=dims,
            vmem_limit_bytes=vmem_limit,
        ),
        cost_estimate=cost,
    )(c_arr, x, w, bias_row)

    return out_padded


class FeatureClippingCalibratorPallas:
    """JAX/Pallas port of the forward pass of FeatureClippingCalibrator."""

    def __init__(self, classifier_weight, classifier_bias,
                 cross_validate="ece", use_bf16_matmul=False):
        # classifier_weight: [num_classes, hidden]  (PyTorch nn.Linear layout)
        # classifier_bias:   [num_classes]
        self.cross_validate = cross_validate
        self.feature_clip = float("inf")

        w = jnp.asarray(classifier_weight)
        b = jnp.asarray(classifier_bias)
        self._num_classes, self._hidden = int(w.shape[0]), int(w.shape[1])

        # Pad the (tiny) classifier params to a lane multiple once at
        # construction so output stores are lane-dense; the (large) feature
        # matrix itself never gets padded or copied.
        n_pad = _round_up(self._num_classes, 128)
        w_t = w.T.astype(jnp.float32)                       # [D, N]
        b_row = b.astype(jnp.float32)[None, :]              # [1, N]
        if n_pad != self._num_classes:
            w_t = jnp.pad(w_t, ((0, 0), (0, n_pad - self._num_classes)))
            b_row = jnp.pad(b_row, ((0, 0), (0, n_pad - self._num_classes)))

        # bf16 weights + bf16 clipped activations hit the bf16-native MXU on
        # v6e/v7x (and halve weight HBM/VMEM bytes); accumulation stays f32.
        self._compute_dtype = jnp.bfloat16 if use_bf16_matmul else jnp.float32
        self._weight_t = w_t.astype(self._compute_dtype)
        self._bias_row = b_row                               # bias stays f32

    def get_feature_clip(self):
        return self.feature_clip

    def feature_clipping(self, features, c=None):
        if c is None:
            c = self.feature_clip
        return jnp.clip(features, -c, c)

    # TODO(synk): set_feature_clip's 2000-step ECE/NLL grid search is a
    # host-side calibration driver (repeated forward + metric eval), not a
    # single kernel; it would simply call __call__ in a loop.

    def __call__(self, features, c=None):
        if c is None:
            c = self.feature_clip
        features = jnp.asarray(features)
        B, D = features.shape
        assert D == self._hidden, "feature dim does not match classifier"

        # Clip threshold travels as a 32-bit scalar on the SMEM scalar path,
        # independent of the feature dtype.
        c_arr = jnp.asarray([c], dtype=jnp.float32)

        N_pad = int(self._weight_t.shape[1])
        tm, tn, tk = _choose_tiles(
            B, D, N_pad,
            x_bytes=features.dtype.itemsize,
            w_bytes=self._weight_t.dtype.itemsize,
            out_bytes=features.dtype.itemsize,
        )
        out = _feature_clipping_forward_impl(
            c_arr, features, self._weight_t, self._bias_row,
            tm=tm, tn=tn, tk=tk,
            compute_dtype=self._compute_dtype,
            vmem_limit=_vmem_limit_bytes(),
        )
        if out.shape[1] != self._num_classes:
            out = out[:, :self._num_classes]
        return out


if __name__ == "__main__":
    key = jax.random.PRNGKey(0)
    k_feat, k_w, k_b = jax.random.split(key, 3)

    batch, hidden, num_classes = 8, 32, 16

    # Deterministic synthetic classifier parameters (PyTorch Linear shapes).
    weight = jax.random.normal(k_w, (num_classes, hidden), jnp.float32) * 0.1
    bias = jax.random.normal(k_b, (num_classes,), jnp.float32) * 0.01
    features = jax.random.normal(k_feat, (batch, hidden), jnp.float32) * 3.0

    calib = FeatureClippingCalibratorPallas(weight, bias)

    clip_c = 1.0
    out = jax.block_until_ready(calib(features, c=clip_c))
    ref = jnp.clip(features, -clip_c, clip_c) @ weight.T + bias
    assert out.shape == (batch, num_classes)
    assert jnp.allclose(out, ref, atol=1e-5, rtol=1e-5)

    # c=None path (C = inf, i.e. no effective clipping).
    out_inf = jax.block_until_ready(calib(features))
    ref_inf = features @ weight.T + bias
    assert jnp.allclose(out_inf, ref_inf, atol=1e-5, rtol=1e-5)

    # Non-aligned shapes: exercises partial batch blocks (no X padding) and
    # class-dim padding of the small classifier params.
    k2, k3 = jax.random.split(k_feat)
    B2, D2, N2 = 300, 200, 70
    w2 = jax.random.normal(k2, (N2, D2), jnp.float32) * 0.05
    b2 = jax.random.normal(k3, (N2,), jnp.float32) * 0.01
    f2 = jax.random.normal(key, (B2, D2), jnp.float32) * 2.0
    calib2 = FeatureClippingCalibratorPallas(w2, b2)
    out2 = jax.block_until_ready(calib2(f2, c=0.5))
    ref2 = jnp.clip(f2, -0.5, 0.5) @ w2.T + b2
    assert out2.shape == (B2, N2)
    assert jnp.allclose(out2, ref2, atol=1e-4, rtol=1e-4)

    # bf16 fast path (bf16-native MXU on v6e/v7x); f32 accumulation.
    calib_bf16 = FeatureClippingCalibratorPallas(weight, bias,
                                                 use_bf16_matmul=True)
    out_bf16 = jax.block_until_ready(calib_bf16(features, c=clip_c))
    assert jnp.allclose(out_bf16, ref, atol=3e-2, rtol=3e-2)

    print("KERNEL_OK")
</pallas_src>

<mosaic_0001>
module attributes {stable_mosaic.version = 11 : i64} {
  func.func @_clip_linear_kernel_fused(%arg0: i32, %arg1: i32, %arg2: memref<1xf32, #tpu.memory_space<smem>>, %arg3: memref<8x32xf32, #tpu.memory_space<vmem>>, %arg4: memref<32x128xf32, #tpu.memory_space<vmem>>, %arg5: memref<1x128xf32, #tpu.memory_space<vmem>>, %arg6: memref<8x128xf32, #tpu.memory_space<vmem>>) attributes {dimension_semantics = [#tpu.dimension_semantics<parallel>, #tpu.dimension_semantics<parallel>], iteration_bounds = array<i64: 1, 1>, scalar_prefetch = 1 : i64, scratch_operands = 0 : i64, tpu.core_type = #tpu.core_type<tc>, window_params = [{transform_indices = @transform_0, window_bounds = array<i64: 8, 32>}, {transform_indices = @transform_1, window_bounds = array<i64: 32, 128>}, {transform_indices = @transform_2, window_bounds = array<i64: 1, 128>}, {transform_indices = @transform_3, window_bounds = array<i64: 8, 128>}]} {
    %c0 = arith.constant 0 : index
    %0 = memref.load %arg2[%c0] : memref<1xf32, #tpu.memory_space<smem>>
    %c0_0 = arith.constant 0 : index
    %c0_1 = arith.constant 0 : index
    %1 = vector.load %arg3[%c0_0, %c0_1] : memref<8x32xf32, #tpu.memory_space<vmem>>, vector<8x32xf32>
    %cst = arith.constant 0.000000e+00 : f32
    %2 = arith.subf %cst, %0 : f32
    %3 = vector.broadcast %2 : f32 to vector<8x32xf32>
    %4 = arith.maximumf %3, %1 : vector<8x32xf32>
    %5 = vector.broadcast %0 : f32 to vector<8x32xf32>
    %6 = arith.minimumf %5, %4 : vector<8x32xf32>
    %c0_2 = arith.constant 0 : index
    %c0_3 = arith.constant 0 : index
    %7 = vector.load %arg4[%c0_2, %c0_3] : memref<32x128xf32, #tpu.memory_space<vmem>>, vector<32x128xf32>
    %cst_4 = arith.constant dense<0.000000e+00> : vector<8x128xf32>
    %8 = tpu.matmul %6, %7, %cst_4 {dimension_numbers = #tpu.dot_dimension_numbers<[1], [0], [0], [1], [0, 0, 1, 1], [], []>} : vector<8x32xf32>, vector<32x128xf32>, vector<8x128xf32> -> vector<8x128xf32>
    %c0_5 = arith.constant 0 : index
    %c0_6 = arith.constant 0 : index
    %9 = vector.load %arg5[%c0_5, %c0_6] : memref<1x128xf32, #tpu.memory_space<vmem>>, vector<1x128xf32>
    %10 = vector.broadcast %9 : vector<1x128xf32> to vector<8x128xf32>
    %11 = arith.addf %8, %10 : vector<8x128xf32>
    %c0_7 = arith.constant 0 : index
    %c0_8 = arith.constant 0 : index
    %12 = vector.load %arg6[%c0_7, %c0_8] : memref<8x128xf32, #tpu.memory_space<vmem>>, vector<8x128xf32>
    tpu.vector_store %arg6[%c0_7, %c0_8], %11 {strides = array<i32>} : memref<8x128xf32, #tpu.memory_space<vmem>>, vector<8x128xf32>,
    return
  }
  func.func @transform_0(%arg0: i32, %arg1: i32, %arg2: memref<1xf32, #tpu.memory_space<smem>>) -> (i32, i32) {
    %c0_i32 = arith.constant 0 : i32
    %c0_i32_0 = arith.constant 0 : i32
    return %arg0, %c0_i32 : i32, i32
  }
  func.func @transform_1(%arg0: i32, %arg1: i32, %arg2: memref<1xf32, #tpu.memory_space<smem>>) -> (i32, i32) {
    %c0_i32 = arith.constant 0 : i32
    %c0_i32_0 = arith.constant 0 : i32
    return %c0_i32, %arg1 : i32, i32
  }
  func.func @transform_2(%arg0: i32, %arg1: i32, %arg2: memref<1xf32, #tpu.memory_space<smem>>) -> (i32, i32) {
    %c0_i32 = arith.constant 0 : i32
    %c0_i32_0 = arith.constant 0 : i32
    return %c0_i32, %arg1 : i32, i32
  }
  func.func @transform_3(%arg0: i32, %arg1: i32, %arg2: memref<1xf32, #tpu.memory_space<smem>>) -> (i32, i32) {
    %c0_i32 = arith.constant 0 : i32
    return %arg0, %arg1 : i32, i32
  }
}

</mosaic_0001>

<bundles_post_ra>
// kernel: _feature_clipping_forward_impl.1
= control target key start
LH: loop header
LB: loop body
LE: loop exit
PB: predicated region body
PF: predicated region fallthrough
CT: control target
= control target key end

     0   :  { %10 = vsyncpa [#allocation5], 0  ;;  %s341_s0 = inlined_call_operand.<no memory space> [shape: f32[1], index: 0, kind: input, shape index: {}]   ;;  %s342_s1 = inlined_call_operand.hbm [shape: f32[8,32], index: 1, kind: input, shape index: {}]   ;;  %s343_s2 = inlined_call_operand.hbm [shape: f32[32,128], index: 2, kind: input, shape index: {}]   ;;  %s344_s3 = inlined_call_operand.vmem [shape: f32[1,128], index: 3, kind: input, shape index: {}]   ;;  %s345_s4 = inlined_call_operand.hbm [shape: f32[8,128], index: 4, kind: output, shape index: {}]  }
   0x1   :  { %11 = vsyncpa [#allocation8], 0 }
   0x2   :  { %12 = vsyncpa [#allocation6], 0  ;;  %s256_s15 = smov [#allocation4]   ;;  %s257_s17 = smov [#allocation7]  }
   0x3   :  { %s19_s16 = sshll.u32 %s256_s15, 4  ;;  %s28_s18 = sshll.u32 %s257_s17, 4  ;;  %s20_s16 = int_to_ptr.vmem [resolvable:$true] %s19_s16  ;;  %s289_s18 = int_to_ptr.vmem [resolvable:$true] %s28_s18 }
   0x4   :  { %s184_s21 = scalar_lea.hbm %s342_s1, 128 }
   0x5   :  { %p185_p0 = scmp.ne.s32.totalorder %s342_s1, %s184_s21  ;;  %p188_p1 = scmp.lt.u32.totalorder %s184_s21, %s342_s1 }
   0x7   :  { %p190_p2 = pnand %p188_p1, %p185_p0 }
   0x9   :  { %193 = shalt.err (!%p190_p2)
}
   0xa   :  { %s194_s26 = scalar_lea.vmem %s20_s16, 128  ;;  %p199_p4 = scmp.lt.s32.totalorder %s20_s16, %s20_s16 }
   0xb   :  { %p195_p3 = scmp.ne.s32.totalorder %s20_s16, %s194_s26  ;;  %p200_p5 = scmp.lt.s32.totalorder %s194_s26, %s194_s26 }
   0xd   :  { %p201_p6 = por %p200_p5, %p199_p4 }
   0xf   :  { %p202_p7 = pnand %p201_p6, %p195_p3 }
  0x11   :  { %205 = shalt.err (!%p202_p7)
}
  0x12   :  { %22 = dma.hbm_to_vmem [thread:$0]  %s342_s1, 128, %s20_s16, [#allocation5]  }
  0x13   :  { %s206_s5 = scalar_lea.hbm %s343_s2, 512 }
  0x14   :  { %p207_p8 = scmp.ne.s32.totalorder %s343_s2, %s206_s5  ;;  %p210_p9 = scmp.lt.u32.totalorder %s206_s5, %s343_s2 }
  0x16   :  { %p212_p10 = pnand %p210_p9, %p207_p8 }
  0x18   :  { %215 = shalt.err (!%p212_p10)
}
  0x19   :  { %s216_s10 = scalar_lea.vmem %s289_s18, 512  ;;  %p221_p12 = scmp.lt.s32.totalorder %s289_s18, %s289_s18 }
  0x1a   :  { %p217_p11 = scmp.ne.s32.totalorder %s289_s18, %s216_s10  ;;  %p222_p13 = scmp.lt.s32.totalorder %s216_s10, %s216_s10 }
  0x1c   :  { %p223_p0 = por %p222_p13, %p221_p12 }
  0x1e   :  { %p224_p1 = pnand %p223_p0, %p217_p11 }
  0x20   :  { %227 = shalt.err (!%p224_p1)
}
  0x21   :  { %s258_s1 = smov 128   ;;  %s259_s11 = smov 8  }
  0x22   :  { %34 = dma.hbm_to_vmem [thread:$0]  %s343_s2, 512, %s289_s18, [#allocation8], %s258_s1, %s258_s1, %s259_s11  }
  0x23   :  { %250 = dma.done.wait [#allocation5], 128  }
  0x24   :  { %251 = vsyncadd [#allocation5], 4294967168 }
  0x25   :  { %252 = dma.done.wait [#allocation8], 512  }
  0x26   :  { %253 = vsyncadd [#allocation8], 4294966784  ;;  %v260_v0 = vmov 0.0|0.0   ;;  %vm261_vm0 = vmmov 0   ;;  %v262_v1 = vmov 0.0   ;;  %s45_s16 = ssub.f32 0.0, %s341_s0  ;;  %v48_v11 = vstv %s341_s0 }
  0x27   :  { %170 = vmatprep.subr.bf16.mxu0 %v260_v0  ;;  %167 = vmatprep.mubr.msk.f32.mxu0 %vm261_vm0, %v262_v1  ;;  %v50_v3 = vld [vmem:[#allocation7] sm:$0xff]  ;;  %v51_v4 = vld [vmem:[#allocation7 + $0x8] sm:$0xff]  ;;  %v52_v5 = vld [vmem:[#allocation7 + $0x10] sm:$0xff]  ;;  %vm61_vm1 = vcmask 261120   ;;  %s263_s20 = smov [#allocation9]  }
  0x28   :  { %v46_v2 = vstv %s45_s16  ;;  %v171_v6 = vpack.c.bf16 %v51_v4, %v50_v3  ;;  %v53_v7 = vld [vmem:[#allocation7 + $0x18] sm:$0xff]  ;;  %s142_s21 = sshll.u32 %s263_s20, 4  ;;  %s143_s21 = int_to_ptr.vmem [resolvable:$true] %s142_s21 }
  0x29   :  { %v44_v8 = vld [vmem:[#allocation4] sm:$0xff]  ;;  %v174_v10 = vpack.c.bf16 %v53_v7, %v52_v5  ;;  %s228_s22 = scalar_lea.vmem %s143_s21, 128  ;;  %p233_p3 = scmp.lt.s32.totalorder %s143_s21, %s143_s21 }
  0x2a   :  { %v47_v9 = vmax.f32 %v46_v2, %v44_v8  ;;  %172 = vmatpush3.bf16.msra.mxu0 %v171_v6  ;;  %v152_v13 = vld [vmem:[%s344_s3] ss:$0 sm:$0xff]  ;;  %p229_p2 = scmp.ne.s32.totalorder %s143_s21, %s228_s22  ;;  %p234_p4 = scmp.lt.s32.totalorder %s228_s22, %s228_s22 }
  0x2b   :  { %173 = vmatprep.subr.bf16.mxu0 %v260_v0 }
  0x2c   :  { %v49_v12 = vmin.f32 %v48_v11, %v47_v9  ;;  %p235_p5 = por %p234_p4, %p233_p3 }
  0x2e   :  { %175 = vmatpush3.bf16.msra.mxu0 %v174_v10  ;;  %p236_p6 = pnand %p235_p5, %p229_p2 }
  0x31   :  { %168 = vmatmul.mubr.msk.f32.vlgmr.msra.gmra.mrb[0].mxu0 %vm61_vm1, %v49_v12 }
 0x104   :  { %v131_v14 = vpop.f32.mrb[0].mxu0 }
 0x105   :  { %v132_v15 = vadd.f32 %v152_v13, %v131_v14  ;;  %v169_v16 = vpop.f32.mrb[1].mxu0 }
 0x107   :  { %135 = vst [vmem:[#allocation9] sm:$0xff] %v132_v15 }
 0x108   :  { %239 = shalt.err (!%p236_p6)
}
 0x109   :  { %s240_s24 = scalar_lea.hbm %s345_s4, 128 }
 0x10a   :  { %p241_p7 = scmp.ne.s32.totalorder %s345_s4, %s240_s24  ;;  %p244_p8 = scmp.lt.u32.totalorder %s240_s24, %s345_s4 }
 0x10c   :  { %p246_p9 = pnand %p244_p8, %p241_p7 }
 0x10e   :  { %249 = shalt.err (!%p246_p9)
}
 0x10f   :  { %145 = dma.vmem_to_hbm [thread:$0]  %s143_s21, 128, %s345_s4, [#allocation6]  }
 0x110   :  { %254 = dma.done.wait [#allocation6], 128  }
 0x111   :  { %255 = vsyncadd [#allocation6], 4294967168 }
 0x112   :  { %149 = vsyncpa [#allocation5], 1 }
 0x113   :  { %150 = vsyncpa [#allocation8], 1 }
 0x114   :  { %151 = vsyncpa [#allocation6], 1 }

</bundles_post_ra>
